<compile_context>
chip_gen: v6e
topology: v6e:2x2x1
jax: 0.10.0
libtpu: 0.0.40
codegen_flags: <defaults>
</compile_context>

<pallas_src>
import functools

import jax
import jax.numpy as jnp
from jax.experimental import pallas as pl
from jax.experimental.pallas import tpu as pltpu


def _concat_pool_kernel(x_ref, out_ref, max_sc, sum_sc, *, hw, tk, need_mask):
    """Grid = (row_blocks, hw_blocks); hw axis is the reduction axis (last)."""
    k = pl.program_id(1)

    @pl.when(k == 0)
    def _():
        max_sc[...] = jnp.full_like(max_sc, -jnp.inf)
        sum_sc[...] = jnp.zeros_like(sum_sc)

    x = x_ref[...].astype(jnp.float32)  # (rt, tk); f32 is exact for max
    if need_mask:
        # Ragged last spatial block: mask columns beyond hw.
        col = k * tk + jax.lax.broadcasted_iota(jnp.int32, x.shape, 1)
        valid = col < hw
        x_max = jnp.where(valid, x, -jnp.inf)
        x_sum = jnp.where(valid, x, 0.0)
    else:
        x_max = x
        x_sum = x

    max_sc[...] = jnp.maximum(max_sc[...], jnp.max(x_max, axis=-1, keepdims=True))
    sum_sc[...] = sum_sc[...] + jnp.sum(x_sum, axis=-1, keepdims=True)

    @pl.when(k == pl.num_programs(1) - 1)
    def _():
        mean = sum_sc[...] * jnp.float32(1.0 / hw)
        out_ref[...] = jnp.concatenate([max_sc[...], mean], axis=-1).astype(out_ref.dtype)


def adaptive_concat_pool2d(x, *, target_block_bytes=2 * 1024 * 1024,
                           hw_tile=None):
    """AdaptiveConcatPool2d with output size 1.

    x: (N, C, H, W) -> (N, 2*C, 1, 1), concat([max_pool, avg_pool], axis=1).
    """
    N, C, H, W = x.shape
    rows = N * C
    hw = H * W
    x2d = x.reshape(rows, hw)

    itemsize = x.dtype.itemsize
    bytes_per_row = hw * itemsize

    # ---- row tile: multiple of 8 sized to ~target_block_bytes per step -----
    if rows <= 8:
        rt = rows  # equals full dim -> always a legal block shape
    else:
        want = max(8, (target_block_bytes // max(bytes_per_row, 1)) // 8 * 8)
        cap_half = max(8, (rows // 2) // 8 * 8)   # keep >=2 row steps (v7x 2 TCs)
        cap_rows = max(8, (rows // 8) * 8)
        rt = min(want, cap_half, cap_rows)

    # ---- spatial tile: whole row if it fits, else multiple-of-128 tiles ----
    hw_block_limit = 4 * 1024 * 1024  # per input block (Pallas double-buffers it)
    if hw_tile is not None:
        tk = min(hw_tile, hw)
    elif rt * bytes_per_row <= hw_block_limit:
        tk = hw
    else:
        rt = rows if rows <= 8 else 8
        tk = max(128, min((hw // 128) * 128,
                          (hw_block_limit // max(rt * itemsize, 1)) // 128 * 128))

    need_mask = (hw % tk) != 0
    grid = (pl.cdiv(rows, rt), pl.cdiv(hw, tk))

    out = pl.pallas_call(
        functools.partial(_concat_pool_kernel, hw=hw, tk=tk, need_mask=need_mask),
        out_shape=jax.ShapeDtypeStruct((rows, 2), x.dtype),
        grid_spec=pltpu.PrefetchScalarGridSpec(
            num_scalar_prefetch=0,
            grid=grid,
            in_specs=[pl.BlockSpec((rt, tk), lambda i, k: (i, k))],
            out_specs=pl.BlockSpec((rt, 2), lambda i, k: (i, 0)),
            scratch_shapes=[
                pltpu.VMEM((rt, 1), jnp.float32),  # running max
                pltpu.VMEM((rt, 1), jnp.float32),  # running sum
            ],
        ),
        compiler_params=pltpu.CompilerParams(
            dimension_semantics=("parallel", "arbitrary"),
            vmem_limit_bytes=32 * 1024 * 1024,
        ),
    )(x2d)

    max_out = out[:, 0].reshape(N, C, 1, 1)
    avg_out = out[:, 1].reshape(N, C, 1, 1)
    # PyTorch order: cat([max_pool(x), avg_pool(x)], dim=1)
    return jnp.concatenate([max_out, avg_out], axis=1)


def _reference(x):
    ref_max = jnp.max(x, axis=(2, 3), keepdims=True)
    ref_avg = jnp.mean(x, axis=(2, 3), keepdims=True)
    return jnp.concatenate([ref_max, ref_avg], axis=1)


if __name__ == "__main__":
    key = jax.random.PRNGKey(0)

    # Main case: (2, 4, 16, 16) -> (2, 8, 1, 1). Whole-row spatial block.
    x = jax.random.normal(key, (2, 4, 16, 16), dtype=jnp.float32)
    out = jax.block_until_ready(adaptive_concat_pool2d(x))
    assert out.shape == (2, 8, 1, 1), out.shape
    assert jnp.allclose(out, _reference(x), atol=1e-5, rtol=1e-5)

    # Exercise the tiled-hw reduction path with a masked ragged last block.
    k2 = jax.random.fold_in(key, 1)
    x2 = jax.random.normal(k2, (2, 3, 13, 11), dtype=jnp.float32)
    out2 = jax.block_until_ready(adaptive_concat_pool2d(x2, hw_tile=128))
    assert out2.shape == (2, 6, 1, 1), out2.shape
    assert jnp.allclose(out2, _reference(x2), atol=1e-5, rtol=1e-5)

    # Exercise ragged row blocks (rows = 20, rt = 8 -> 3 row steps, clipped tail).
    k3 = jax.random.fold_in(key, 2)
    x3 = jax.random.normal(k3, (4, 5, 4, 4), dtype=jnp.float32)
    out3 = jax.block_until_ready(adaptive_concat_pool2d(x3))
    assert out3.shape == (4, 10, 1, 1), out3.shape
    assert jnp.allclose(out3, _reference(x3), atol=1e-5, rtol=1e-5)

    print("KERNEL_OK")
</pallas_src>

<mosaic_0001>
module attributes {stable_mosaic.version = 11 : i64} {
  func.func @_concat_pool_kernel(%arg0: i32, %arg1: i32, %arg2: memref<8x256xf32, #tpu.memory_space<vmem>>, %arg3: memref<8x2xf32, #tpu.memory_space<vmem>>, %arg4: memref<8x1xf32, #tpu.memory_space<vmem>>, %arg5: memref<8x1xf32, #tpu.memory_space<vmem>>) attributes {dimension_semantics = [#tpu.dimension_semantics<parallel>, #tpu.dimension_semantics<arbitrary>], iteration_bounds = array<i64: 1, 1>, scalar_prefetch = 0 : i64, scratch_operands = 2 : i64, tpu.core_type = #tpu.core_type<tc>, window_params = [{transform_indices = @transform_0, window_bounds = array<i64: 8, 256>}, {transform_indices = @transform_1, window_bounds = array<i64: 8, 2>}]} {
    %c0_i32 = arith.constant 0 : i32
    %0 = arith.cmpi eq, %arg1, %c0_i32 : i32
    %1 = arith.extui %0 : i1 to i32
    %c0_i32_0 = arith.constant 0 : i32
    %2 = arith.cmpi ne, %1, %c0_i32_0 : i32
    scf.if %2 {
      %cst_13 = arith.constant 0xFF800000 : f32
      %17 = vector.broadcast %cst_13 : f32 to vector<8x1xf32>
      %c0_14 = arith.constant 0 : index
      %c0_15 = arith.constant 0 : index
      %18 = vector.load %arg4[%c0_14, %c0_15] : memref<8x1xf32, #tpu.memory_space<vmem>>, vector<8x1xf32>
      tpu.vector_store %arg4[%c0_14, %c0_15], %17 {strides = array<i32>} : memref<8x1xf32, #tpu.memory_space<vmem>>, vector<8x1xf32>,
      %cst_16 = arith.constant 0.000000e+00 : f32
      %19 = vector.broadcast %cst_16 : f32 to vector<8x1xf32>
      %c0_17 = arith.constant 0 : index
      %c0_18 = arith.constant 0 : index
      %20 = vector.load %arg5[%c0_17, %c0_18] : memref<8x1xf32, #tpu.memory_space<vmem>>, vector<8x1xf32>
      tpu.vector_store %arg5[%c0_17, %c0_18], %19 {strides = array<i32>} : memref<8x1xf32, #tpu.memory_space<vmem>>, vector<8x1xf32>,
    } else {
    }
    %c0 = arith.constant 0 : index
    %c0_1 = arith.constant 0 : index
    %3 = vector.load %arg2[%c0, %c0_1] : memref<8x256xf32, #tpu.memory_space<vmem>>, vector<8x256xf32>
    %c0_2 = arith.constant 0 : index
    %c0_3 = arith.constant 0 : index
    %4 = vector.load %arg4[%c0_2, %c0_3] : memref<8x1xf32, #tpu.memory_space<vmem>>, vector<8x1xf32>
    %cst = arith.constant dense<0xFF800000> : vector<8xf32>
    %5 = vector.multi_reduction <maximumf>, %3, %cst [1] : vector<8x256xf32> to vector<8xf32>
    %6 = vector.shape_cast %5 : vector<8xf32> to vector<8x1xf32>
    %7 = arith.maximumf %4, %6 : vector<8x1xf32>
    %c0_4 = arith.constant 0 : index
    %c0_5 = arith.constant 0 : index
    %8 = vector.load %arg4[%c0_4, %c0_5] : memref<8x1xf32, #tpu.memory_space<vmem>>, vector<8x1xf32>
    tpu.vector_store %arg4[%c0_4, %c0_5], %7 {strides = array<i32>} : memref<8x1xf32, #tpu.memory_space<vmem>>, vector<8x1xf32>,
    %c0_6 = arith.constant 0 : index
    %c0_7 = arith.constant 0 : index
    %9 = vector.load %arg5[%c0_6, %c0_7] : memref<8x1xf32, #tpu.memory_space<vmem>>, vector<8x1xf32>
    %cst_8 = arith.constant dense<0.000000e+00> : vector<8xf32>
    %10 = vector.multi_reduction <add>, %3, %cst_8 [1] : vector<8x256xf32> to vector<8xf32>
    %11 = vector.shape_cast %10 : vector<8xf32> to vector<8x1xf32>
    %12 = arith.addf %9, %11 : vector<8x1xf32>
    %c0_9 = arith.constant 0 : index
    %c0_10 = arith.constant 0 : index
    %13 = vector.load %arg5[%c0_9, %c0_10] : memref<8x1xf32, #tpu.memory_space<vmem>>, vector<8x1xf32>
    tpu.vector_store %arg5[%c0_9, %c0_10], %12 {strides = array<i32>} : memref<8x1xf32, #tpu.memory_space<vmem>>, vector<8x1xf32>,
    %c0_i32_11 = arith.constant 0 : i32
    %14 = arith.cmpi eq, %arg1, %c0_i32_11 : i32
    %15 = arith.extui %14 : i1 to i32
    %c0_i32_12 = arith.constant 0 : i32
    %16 = arith.cmpi ne, %15, %c0_i32_12 : i32
    scf.if %16 {
      %c0_13 = arith.constant 0 : index
      %c0_14 = arith.constant 0 : index
      %17 = vector.load %arg5[%c0_13, %c0_14] : memref<8x1xf32, #tpu.memory_space<vmem>>, vector<8x1xf32>
      %cst_15 = arith.constant 3.906250e-03 : f32
      %18 = vector.broadcast %cst_15 : f32 to vector<8x1xf32>
      %19 = arith.mulf %17, %18 : vector<8x1xf32>
      %c0_16 = arith.constant 0 : index
      %c0_17 = arith.constant 0 : index
      %20 = vector.load %arg4[%c0_16, %c0_17] : memref<8x1xf32, #tpu.memory_space<vmem>>, vector<8x1xf32>
      %21 = tpu.concatenate %20, %19 in 1 : vector<8x1xf32>, vector<8x1xf32> -> vector<8x2xf32>
      %c0_18 = arith.constant 0 : index
      %c0_19 = arith.constant 0 : index
      %22 = vector.load %arg3[%c0_18, %c0_19] : memref<8x2xf32, #tpu.memory_space<vmem>>, vector<8x2xf32>
      tpu.vector_store %arg3[%c0_18, %c0_19], %21 {strides = array<i32>} : memref<8x2xf32, #tpu.memory_space<vmem>>, vector<8x2xf32>,
    } else {
    }
    return
  }
  func.func @transform_0(%arg0: i32, %arg1: i32) -> (i32, i32) {
    %c0_i32 = arith.constant 0 : i32
    return %arg0, %arg1 : i32, i32
  }
  func.func @transform_1(%arg0: i32, %arg1: i32) -> (i32, i32) {
    %c0_i32 = arith.constant 0 : i32
    %c0_i32_0 = arith.constant 0 : i32
    return %arg0, %c0_i32 : i32, i32
  }
}

</mosaic_0001>

<bundles_post_ra>
// kernel: tpu_custom_call.1
= control target key start
LH: loop header
LB: loop body
LE: loop exit
PB: predicated region body
PF: predicated region fallthrough
CT: control target
= control target key end

     0   :  { %6 = vsyncpa [#allocation5], 0  ;;  %s86_s6 = smov [#allocation4]   ;;  %s111_s0 = inlined_call_operand.hbm [shape: f32[8,256], index: 0, kind: input, shape index: {}]   ;;  %s112_s1 = inlined_call_operand.vmem [shape: f32[8,2], index: 1, kind: output, shape index: {}]  }
   0x1   :  { %s13_s7 = sshll.u32 %s86_s6, 4  ;;  %s14_s7 = int_to_ptr.vmem [resolvable:$true] %s13_s7 }
   0x2   :  { %s72_s8 = scalar_lea.vmem %s14_s7, 256  ;;  %p77_p1 = scmp.lt.s32.totalorder %s14_s7, %s14_s7 }
   0x3   :  { %p73_p0 = scmp.ne.s32.totalorder %s14_s7, %s72_s8  ;;  %p78_p2 = scmp.lt.s32.totalorder %s72_s8, %s72_s8 }
   0x5   :  { %p79_p3 = por %p78_p2, %p77_p1 }
   0x7   :  { %p80_p4 = pnand %p79_p3, %p73_p0 }
   0x9   :  { %83 = shalt.err (!%p80_p4)
}
   0xa   :  { %16 = dma.hbm_to_vmem [thread:$0]  %s111_s0, 256, %s14_s7, [#allocation5]  }
   0xb   :  { %84 = dma.done.wait [#allocation5], 256  }
   0xc   :  { %85 = vsyncadd [#allocation5], 4294967040  ;;  %vm24_vm0 = vcmask 7168   ;;  %v87_v0 = vmov 0.0   ;;  %v27_v1 = vld [vmem:[#allocation4] sm:$0xff]  ;;  %v28_v2 = vld [vmem:[#allocation4 + $0x8] sm:$0xff] }
   0xd   :  { %26 = vst.msk [vmem:[#allocation3] sm:$0xff] %vm24_vm0, %v87_v0  ;;  %v37_v3 = vadd.f32 %v28_v2, %v27_v1  ;;  %v30_v4 = vmax.f32 %v27_v1, %v28_v2  ;;  %v88_v5 = vmov -inf   ;;  %s89_s0 = smov 1   ;;  %vm53_vm1 = vcmask 15360  }
   0xe   :  { %25 = vst.msk [vmem:[#allocation2] sm:$0xff] %vm24_vm0, %v88_v5 }
   0xf   :  { %38 = vadd.xlane.f32.xlu0 %v37_v3 }
  0x13   :  { %31 = vmax.xlane.f32.xlu0 %v30_v4 }
  0x14   :  { %v36_v6 = vld [vmem:[#allocation3] sm:$0xff] }
  0x15   :  { %v29_v9 = vld [vmem:[#allocation2] sm:$0xff] }
  0x98   :  { %v39_v7 = vpop.xlane.xlu0 %38 }
  0x99   :  { %v40_v8 = vadd.f32 %v39_v7, %v36_v6 }
  0x9b   :  { %41 = vst.msk [vmem:[#allocation3] sm:$0xff] %vm24_vm0, %v40_v8 }
  0x9c   :  { %v32_v10 = vpop.xlane.xlu0 %31 }
  0x9d   :  { %v33_v11 = vmax.f32 %v29_v9, %v32_v10 }
  0x9f   :  { %35 = vst.msk [vmem:[#allocation2] sm:$0xff] %vm24_vm0, %v33_v11 }
  0xa2   :  { %v45_v12 = vld [vmem:[#allocation3] sm:$0xff] }
  0xa3   :  { %v46_v13 = vmul.f32 0.00390625, %v45_v12 }
  0xa5   :  { %49 = vrot.lane.b32.xlu1 %v46_v13, %s89_s0 }
  0xa6   :  { %v47_v14 = vld [vmem:[#allocation2] sm:$0xff] }
 0x117   :  { %v50_v15 = vpop.permute.xlu1 %49 }
 0x118   :  { %v52_v16 = vsel %vm24_vm0, %v47_v14, %v50_v15 }
 0x119   :  { %54 = vst.msk [vmem:[%s112_s1] sm:$0xff] %vm53_vm1, %v52_v16 }
 0x11a   :  { %59 = vsyncpa [#allocation5], 1 }

</bundles_post_ra>
